<compile_context>
chip_gen: v5e
topology: v5e:2x2
jax: 0.10.0
libtpu: 0.0.40
codegen_flags: <defaults>
</compile_context>

<pallas_src>
import jax
import jax.numpy as jnp
from jax.experimental import pallas as pl
from jax.experimental.pallas import tpu as pltpu


_LANE = 128
# MXU-native "NT" contraction: both operands contract on their LAST (lane)
# dim, so neither the enc tile nor W_e is ever transposed/materialised.
_NT_DIMS = (((1,), (1,)), ((), ()))


def _make_kernel(S, S_pad, s_tile, n_s):
    def kernel(enc_ref, we_ref, h_ref, v_ref, out_ref):
        s = pl.program_id(1)

        # energy^T tile: (D, s_tile) = W_e (D, E2) x enc_tile (s_tile, E2)^T.
        # f32 accumulation regardless of the (possibly bf16) input dtype; the
        # hidden-term column (D, 1) broadcasts over lanes.
        energy_t = jnp.tanh(
            jax.lax.dot_general(
                we_ref[...], enc_ref[...], dimension_numbers=_NT_DIMS,
                preferred_element_type=jnp.float32)
            + h_ref[...])                                        # (D, s_tile)

        # Score row on VPU (mul) + XLU (sublane reduce) instead of an M=1 MXU
        # matmul: (1, s_tile).
        row = jnp.sum(v_ref[...] * energy_t, axis=0, keepdims=True)

        # The output block index is constant along the S axis, so the
        # (n_s, s_tile) block stays resident in VMEM; write this tile's row
        # directly into it (no scores scratch).  Correctness relies on the S
        # tiles of one batch element running in order s = 0..n_s-1 on the same
        # core, which holds for the ("parallel", "arbitrary") grid below.
        out_ref[pl.ds(s, 1), :] = row

        # Last S tile: mask the padded tail, softmax over the whole sequence,
        # one lane-dense store (s_tile is a multiple of 128).
        @pl.when(s == n_s - 1)
        def _():
            sc = out_ref[...]                                    # (n_s, s_tile)
            if S_pad != S:                                       # static branch
                r = jax.lax.broadcasted_iota(jnp.int32, (n_s, s_tile), 0)
                c = jax.lax.broadcasted_iota(jnp.int32, (n_s, s_tile), 1)
                # jnp.where selects, so NaN/garbage in the (never-DMA'd) padded
                # tail of a partial enc block cannot propagate.
                sc = jnp.where(r * s_tile + c < S, sc, -jnp.inf)
            m = jnp.max(sc, keepdims=True)
            e = jnp.exp(sc - m)
            out_ref[...] = (e * pl.reciprocal(jnp.sum(e, keepdims=True),
                                              approx=False)
                            ).astype(out_ref.dtype)

    return kernel


def bahdanau_attention(decoder_hidden, encoder_outputs, weight, bias,
                       weight_operator, *, s_tile=None, use_bf16=False,
                       batch_dim_semantics="parallel"):
    """decoder_hidden [B, D], encoder_outputs [B, S, 2E] (f32 or bf16),
    weight [D, D + 2E] (PyTorch Linear layout, cat order = [hidden ; enc]),
    bias [D], weight_operator [D].  Returns softmax attention weights [B, S]
    as float32."""
    B, D = decoder_hidden.shape
    _, S, E2 = encoder_outputs.shape
    assert weight.shape == (D, D + E2)

    # Split the Linear weight (cat order (hidden, enc): the first D input
    # columns act on the hidden state).  Both slices stay in their native
    # (out_features, in_features) layout.
    w_h = weight[:, :D]                                          # (D, D)
    w_e = weight[:, D:]                                          # (D, E2)

    # Hidden term hoisted fully out of the kernel: one small XLA matmul for
    # all batch elements -> (B, D, 1) columns.
    h_cols = (jnp.matmul(decoder_hidden, w_h.T,
                         precision=jax.lax.Precision.HIGHEST)
              + bias)[..., None].astype(jnp.float32)             # (B, D, 1)
    v_col = weight_operator.reshape(D, 1).astype(jnp.float32)    # (D, 1)

    # Dominant enc stream: consumed in native (B, S, E2) layout (no wrapper
    # transpose / pad HBM passes).  Optional bf16 halves its DMA bytes;
    # ideally that cast fuses with the upstream producer of encoder_outputs.
    enc = encoder_outputs
    if use_bf16 and enc.dtype != jnp.bfloat16:
        enc = enc.astype(jnp.bfloat16)
    w_e = w_e.astype(enc.dtype)
    enc_bytes = jnp.dtype(enc.dtype).itemsize

    # S tiling (lane axis of every block).  Default = whole 128-padded S in one
    # tile; cap only when the double-buffered enc block would exceed a budget
    # that is safe on v5e/v6e (128 MiB VMEM) and v7x (64 MiB).  The padded
    # tail of a partial block is neutralised by the -inf mask in the kernel.
    S_up = pl.cdiv(S, _LANE) * _LANE
    enc_budget = 8 << 20                        # double-buffered enc tile bytes
    max_tile = max(_LANE, (enc_budget // (2 * E2 * enc_bytes)) // _LANE * _LANE)
    if s_tile is None:
        s_tile = min(S_up, max_tile)
    else:
        s_tile = min(S_up, max(_LANE, pl.cdiv(s_tile, _LANE) * _LANE))
    n_s = pl.cdiv(S, s_tile)
    S_pad = n_s * s_tile
    # TODO(synk): for extremely long S the resident (n_s, s_tile) output block
    # would want a streaming two-pass softmax; and for very large D*E2 on v7x,
    # single-buffer the constant W_e spec (pipeline_mode=pl.Buffered(1)).

    out = pl.pallas_call(
        _make_kernel(S, S_pad, s_tile, n_s),
        out_shape=jax.ShapeDtypeStruct((B, n_s, s_tile), jnp.float32),
        grid_spec=pltpu.PrefetchScalarGridSpec(
            num_scalar_prefetch=0,
            grid=(B, n_s),
            in_specs=[
                pl.BlockSpec((None, s_tile, E2), lambda b, s: (b, s, 0)),  # enc tile (native)
                pl.BlockSpec((D, E2), lambda b, s: (0, 0)),                # W_e
                pl.BlockSpec((None, D, 1), lambda b, s: (b, 0, 0)),        # hidden-term column
                pl.BlockSpec((D, 1), lambda b, s: (0, 0)),                 # weight_operator col
            ],
            out_specs=pl.BlockSpec((None, n_s, s_tile),
                                   lambda b, s: (b, 0, 0)),
        ),
        compiler_params=pltpu.CompilerParams(
            # On v7x, pass batch_dim_semantics=pltpu.CORE_PARALLEL to shard
            # the batch axis across the 2 TensorCores.
            dimension_semantics=(batch_dim_semantics, "arbitrary"),
            vmem_limit_bytes=32 * 1024 * 1024),
    )(enc, w_e, h_cols, v_col)

    return out.reshape(B, S_pad)[:, :S]


def _reference(decoder_hidden, encoder_outputs, weight, bias, weight_operator):
    B, S, _ = encoder_outputs.shape
    hidden = jnp.repeat(decoder_hidden[:, None, :], S, axis=1)           # [B,S,D]
    cat = jnp.concatenate((hidden, encoder_outputs), axis=2)             # [B,S,D+2E]
    energy = jnp.tanh(jnp.einsum("bsi,di->bsd", cat, weight,
                                 precision=jax.lax.Precision.HIGHEST) + bias)
    scores = jnp.einsum("d,bsd->bs", weight_operator, energy,
                        precision=jax.lax.Precision.HIGHEST)
    return jax.nn.softmax(scores, axis=1)


if __name__ == "__main__":
    # Small, module-consistent shapes.
    encoder_hidden_size = 32
    decoder_hidden_size = 32
    D = decoder_hidden_size
    E2 = 2 * encoder_hidden_size

    key = jax.random.PRNGKey(0)
    k1, k2, k3 = jax.random.split(key, 3)

    # Deterministic parameters (shapes from the module __init__).
    weight_operator = jax.random.uniform(k1, (D,), jnp.float32)              # torch.rand(D)
    attn_w = jax.random.uniform(k2, (D, D + E2), jnp.float32, -0.1, 0.1)     # Linear weight
    attn_b = jax.random.uniform(k3, (D,), jnp.float32, -0.1, 0.1)            # Linear bias

    cases = [
        # (B, S, s_tile, use_bf16, atol)
        (2, 8, None, False, 5e-5),     # tiny S, single lane-padded tile + mask
        (2, 200, 128, False, 5e-5),    # multi-tile path, partial last block
        (3, 300, None, False, 5e-5),   # auto tile size (single 384-lane tile)
        (2, 200, None, True, 3e-2),    # bf16 enc stream (looser tolerance)
    ]
    for (B, S, tile, bf16, atol) in cases:
        kd, ke = jax.random.split(jax.random.fold_in(key, 1000 * S + B))
        decoder_hidden = jax.random.normal(kd, (B, D), jnp.float32)
        encoder_outputs = jax.random.normal(ke, (B, S, E2), jnp.float32)

        out = bahdanau_attention(decoder_hidden, encoder_outputs, attn_w,
                                 attn_b, weight_operator, s_tile=tile,
                                 use_bf16=bf16)
        out = jax.block_until_ready(out)

        ref = _reference(decoder_hidden, encoder_outputs, attn_w, attn_b,
                         weight_operator)
        assert out.shape == (B, S)
        err = float(jnp.max(jnp.abs(out - ref)))
        assert err <= atol, (B, S, tile, bf16, err)
        assert jnp.allclose(jnp.sum(out, axis=1), jnp.ones((B,)), atol=1e-4)

    print("KERNEL_OK")
</pallas_src>

<mosaic_0001>
module attributes {stable_mosaic.version = 11 : i64} {
  func.func @kernel(%arg0: i32, %arg1: i32, %arg2: memref<1x128x64xf32, #tpu.memory_space<vmem>>, %arg3: memref<32x64xf32, #tpu.memory_space<vmem>>, %arg4: memref<1x32x1xf32, #tpu.memory_space<vmem>>, %arg5: memref<32x1xf32, #tpu.memory_space<vmem>>, %arg6: memref<1x1x128xf32, #tpu.memory_space<vmem>>) attributes {dimension_semantics = [#tpu.dimension_semantics<parallel>, #tpu.dimension_semantics<arbitrary>], iteration_bounds = array<i64: 2, 1>, scalar_prefetch = 0 : i64, scratch_operands = 0 : i64, tpu.core_type = #tpu.core_type<tc>, window_params = [{transform_indices = @transform_0, window_bounds = array<i64: 1, 128, 64>}, {pipeline_mode = #tpu.pipeline_mode<synchronous>, transform_indices = @transform_1, window_bounds = array<i64: 32, 64>}, {transform_indices = @transform_2, window_bounds = array<i64: 1, 32, 1>}, {pipeline_mode = #tpu.pipeline_mode<synchronous>, transform_indices = @transform_3, window_bounds = array<i64: 32, 1>}, {transform_indices = @transform_4, window_bounds = array<i64: 1, 1, 128>}]} {
    %c0 = arith.constant 0 : index
    %c0_0 = arith.constant 0 : index
    %0 = vector.load %arg3[%c0, %c0_0] : memref<32x64xf32, #tpu.memory_space<vmem>>, vector<32x64xf32>
    %c0_1 = arith.constant 0 : index
    %c0_2 = arith.constant 0 : index
    %c0_3 = arith.constant 0 : index
    %1 = vector.load %arg2[%c0_1, %c0_2, %c0_3] : memref<1x128x64xf32, #tpu.memory_space<vmem>>, vector<1x128x64xf32>
    %2 = vector.shape_cast %1 : vector<1x128x64xf32> to vector<128x64xf32>
    %cst = arith.constant dense<0.000000e+00> : vector<32x128xf32>
    %3 = tpu.matmul %0, %2, %cst {dimension_numbers = #tpu.dot_dimension_numbers<[1], [1], [0], [0], [0, 0, 1, 0], [], []>} : vector<32x64xf32>, vector<128x64xf32>, vector<32x128xf32> -> vector<32x128xf32>
    %c0_4 = arith.constant 0 : index
    %c0_5 = arith.constant 0 : index
    %c0_6 = arith.constant 0 : index
    %4 = vector.load %arg4[%c0_4, %c0_5, %c0_6] : memref<1x32x1xf32, #tpu.memory_space<vmem>>, vector<1x32x1xf32>
    %5 = vector.shape_cast %4 : vector<1x32x1xf32> to vector<32x1xf32>
    %6 = vector.broadcast %5 : vector<32x1xf32> to vector<32x128xf32>
    %7 = arith.addf %3, %6 : vector<32x128xf32>
    %8 = math.tanh %7 : vector<32x128xf32>
    %c0_7 = arith.constant 0 : index
    %c0_8 = arith.constant 0 : index
    %9 = vector.load %arg5[%c0_7, %c0_8] : memref<32x1xf32, #tpu.memory_space<vmem>>, vector<32x1xf32>
    %10 = vector.broadcast %9 : vector<32x1xf32> to vector<32x128xf32>
    %11 = arith.mulf %10, %8 : vector<32x128xf32>
    %cst_9 = arith.constant dense<0.000000e+00> : vector<128xf32>
    %12 = vector.multi_reduction <add>, %11, %cst_9 [0] : vector<32x128xf32> to vector<128xf32>
    %13 = vector.shape_cast %12 : vector<128xf32> to vector<1x128xf32>
    %c0_10 = arith.constant 0 : index
    %14 = arith.index_cast %arg1 : i32 to index
    %c0_11 = arith.constant 0 : index
    %15 = vector.load %arg6[%c0_10, %14, %c0_11] : memref<1x1x128xf32, #tpu.memory_space<vmem>>, vector<1x1x128xf32>
    %16 = vector.shape_cast %15 : vector<1x1x128xf32> to vector<1x128xf32>
    %17 = vector.shape_cast %13 : vector<1x128xf32> to vector<1x1x128xf32>
    tpu.vector_store %arg6[%c0_10, %14, %c0_11], %17 {strides = array<i32>} : memref<1x1x128xf32, #tpu.memory_space<vmem>>, vector<1x1x128xf32>,
    %c0_i32 = arith.constant 0 : i32
    %18 = arith.cmpi eq, %arg1, %c0_i32 : i32
    %19 = arith.extui %18 : i1 to i32
    %c0_i32_12 = arith.constant 0 : i32
    %20 = arith.cmpi ne, %19, %c0_i32_12 : i32
    scf.if %20 {
      %c0_13 = arith.constant 0 : index
      %c0_14 = arith.constant 0 : index
      %c0_15 = arith.constant 0 : index
      %21 = vector.load %arg6[%c0_13, %c0_14, %c0_15] : memref<1x1x128xf32, #tpu.memory_space<vmem>>, vector<1x1x128xf32>
      %22 = vector.shape_cast %21 : vector<1x1x128xf32> to vector<1x128xf32>
      %23 = tpu.iota {dimensions = array<i32: 0>} : vector<1x128xi32>
      %24 = tpu.iota {dimensions = array<i32: 1>} : vector<1x128xi32>
      %c128_i32 = arith.constant 128 : i32
      %25 = vector.broadcast %c128_i32 : i32 to vector<1x128xi32>
      %26 = arith.muli %23, %25 : vector<1x128xi32>
      %27 = arith.addi %26, %24 : vector<1x128xi32>
      %c8_i32 = arith.constant 8 : i32
      %28 = vector.broadcast %c8_i32 : i32 to vector<1x128xi32>
      %29 = arith.cmpi slt, %27, %28 : vector<1x128xi32>
      %cst_16 = arith.constant 0xFF800000 : f32
      %30 = vector.broadcast %cst_16 : f32 to vector<1x128xf32>
      %31 = arith.select %29, %22, %30 : vector<1x128xi1>, vector<1x128xf32>
      %32 = vector.shape_cast %31 : vector<1x128xf32> to vector<1x1x128xf32>
      %cst_17 = arith.constant dense<0xFF800000> : vector<1xf32>
      %33 = vector.multi_reduction <maximumf>, %32, %cst_17 [1, 2] : vector<1x1x128xf32> to vector<1xf32>
      %34 = vector.shape_cast %33 : vector<1xf32> to vector<1x1x1xf32>
      %35 = vector.extract %34[0, 0, 0] : f32 from vector<1x1x1xf32>
      %36 = vector.broadcast %35 : f32 to vector<1x1xf32>
      %37 = vector.broadcast %36 : vector<1x1xf32> to vector<1x128xf32>
      %38 = arith.subf %31, %37 : vector<1x128xf32>
      %39 = math.exp %38 : vector<1x128xf32>
      %40 = vector.shape_cast %39 : vector<1x128xf32> to vector<1x1x128xf32>
      %cst_18 = arith.constant dense<0.000000e+00> : vector<1xf32>
      %41 = vector.multi_reduction <add>, %40, %cst_18 [1, 2] : vector<1x1x128xf32> to vector<1xf32>
      %42 = vector.shape_cast %41 : vector<1xf32> to vector<1x1x1xf32>
      %43 = vector.extract %42[0, 0, 0] : f32 from vector<1x1x1xf32>
      %44 = vector.broadcast %43 : f32 to vector<1x1xf32>
      %45 = tpu.reciprocal %44 : vector<1x1xf32> -> vector<1x1xf32>
      %46 = vector.broadcast %45 : vector<1x1xf32> to vector<1x128xf32>
      %47 = arith.mulf %39, %46 : vector<1x128xf32>
      %c0_19 = arith.constant 0 : index
      %c0_20 = arith.constant 0 : index
      %c0_21 = arith.constant 0 : index
      %48 = vector.load %arg6[%c0_19, %c0_20, %c0_21] : memref<1x1x128xf32, #tpu.memory_space<vmem>>, vector<1x1x128xf32>
      %49 = vector.shape_cast %48 : vector<1x1x128xf32> to vector<1x128xf32>
      %50 = vector.shape_cast %47 : vector<1x128xf32> to vector<1x1x128xf32>
      tpu.vector_store %arg6[%c0_19, %c0_20, %c0_21], %50 {strides = array<i32>} : memref<1x1x128xf32, #tpu.memory_space<vmem>>, vector<1x1x128xf32>,
    } else {
    }
    return
  }
  func.func @transform_0(%arg0: i32, %arg1: i32) -> (i32, i32, i32) {
    %c0_i32 = arith.constant 0 : i32
    %c0_i32_0 = arith.constant 0 : i32
    return %arg0, %arg1, %c0_i32 : i32, i32, i32
  }
  func.func @transform_1(%arg0: i32, %arg1: i32) -> (i32, i32) {
    %c0_i32 = arith.constant 0 : i32
    %c0_i32_0 = arith.constant 0 : i32
    %c0_i32_1 = arith.constant 0 : i32
    return %c0_i32, %c0_i32_0 : i32, i32
  }
  func.func @transform_2(%arg0: i32, %arg1: i32) -> (i32, i32, i32) {
    %c0_i32 = arith.constant 0 : i32
    %c0_i32_0 = arith.constant 0 : i32
    %c0_i32_1 = arith.constant 0 : i32
    return %arg0, %c0_i32, %c0_i32_0 : i32, i32, i32
  }
  func.func @transform_3(%arg0: i32, %arg1: i32) -> (i32, i32) {
    %c0_i32 = arith.constant 0 : i32
    %c0_i32_0 = arith.constant 0 : i32
    %c0_i32_1 = arith.constant 0 : i32
    return %c0_i32, %c0_i32_0 : i32, i32
  }
  func.func @transform_4(%arg0: i32, %arg1: i32) -> (i32, i32, i32) {
    %c0_i32 = arith.constant 0 : i32
    %c0_i32_0 = arith.constant 0 : i32
    %c0_i32_1 = arith.constant 0 : i32
    return %arg0, %c0_i32, %c0_i32_0 : i32, i32, i32
  }
}

</mosaic_0001>

<bundles_post_ra>
// kernel: tpu_custom_call.1
= control target key start
LH: loop header
LB: loop body
LE: loop exit
PB: predicated region body
PF: predicated region fallthrough
CT: control target
= control target key end

     0   :  { %9 = vsyncpa [#allocation3], 0  ;;  %s1060_s0 = inlined_call_operand.vmem [shape: f32[2,8,64], index: 0, kind: input, shape index: {}]   ;;  %s1061_s1 = inlined_call_operand.vmem [shape: f32[32,64], index: 1, kind: input, shape index: {}]   ;;  %s1062_s2 = inlined_call_operand.vmem [shape: f32[2,32,1], index: 2, kind: input, shape index: {}]   ;;  %s1063_s3 = inlined_call_operand.vmem [shape: f32[32,1], index: 3, kind: input, shape index: {}]   ;;  %s1064_s4 = inlined_call_operand.hbm [shape: f32[2,1,128], index: 4, kind: output, shape index: {}]  }
   0x1   :  { %11 = vsyncpa [#allocation3 + $0x1], 0  ;;  %s834_s15 = smov 0   ;;  %s836_s16 = smov 0  }
   0x2   :  { %s838_s17 = smov 0   ;;  %s840_s18 = smov 0  }
   0x3   :  { %s842_s19 = smov 0   ;;  %s844_s20 = smov 0  }
   0x4 LB: > { %s574_s21 = sadd.s32 4294967295, %s806_s20   ;;  %s575_s22 = sadd.s32 4294967294, %s806_s20   ;;  %s806_s20 = sphi %s844_s20, %s17_s20   ;;  %s802_s19 = sphi %s842_s19, %s1071_s19   ;;  %s798_s18 = sphi %s840_s18, %s1070_s18   ;;  %s794_s17 = sphi %s838_s17, %s1069_s17   ;;  %s790_s16 = sphi %s836_s16, %s1068_s16   ;;  %s786_s15 = sphi %s834_s15, %s1067_s15  }
   0x5   : > { %s29_s23 = sadd.s32 1, %s802_s19  ;;  %s132_s24 = sadd.s32 1, %s794_s17 }
   0x6   : > { %p31_p0 = scmp.ge.s32.totalorder %s29_s23, 2  ;;  %p142_p1 = scmp.ne.s32.totalorder %s794_s17, %s790_s16 }
   0x7   : > { %p143_p2 = scmp.eq.s32.totalorder %s574_s21, 1  ;;  %p148_p3 = scmp.ne.s32.totalorder %s790_s16, %s786_s15 }
   0x8   : > { %s1073_s23 = smov (%p31_p0, %s29_s23), 0  ;;  %p149_p5 = scmp.eq.s32.totalorder %s575_s22, 1 }
   0x9   : > { %p874_p4 = por %p143_p2, %p142_p1  ;;  %s129_s26 = ssub.s32 %s802_s19, %s1073_s23 }
   0xa   : > { %p578_p6 = scmp.ge.s32.totalorder %s806_s20, 1  ;;  %p130_p7 = scmp.eq.s32.totalorder %s129_s26, 0 }
   0xb   : > { %p881_p8 = por %p149_p5, %p148_p3  ;;  %p197_p9 = scmp.lt.s32.totalorder %s806_s20, 3 }
   0xc   : > { %s887_s28 = scalar_select %p130_p7, %s794_s17, %s132_s24  }
   0xd   : > { %p198_p10 = pnand %p578_p6, %p197_p9 }
   0xe   : > { %p235_p11 = scmp.lt.s32.totalorder (!%p198_p10), %s798_s18, 1  ;;  %s230_s12 = sand.u32 (!%p198_p10), 1, %s790_s16  }
   0xf   : > { %201 = sbr.rel (%p198_p10) target bundleno = 650 (0x28a), region = 36  ;;  %s1014_s13 = scalar_lea.vmem (!%p198_p10), [#allocation2], %s230_s12 }
  0x10   : > { %s491_s26 = scalar_lea.hbm (!%p198_p10), %s1064_s4, %s798_s18  ;;  %s483_s5 = scalar_lea.sflag (!%p198_p10), [#allocation3], %s230_s12 }
  0x11   : > { %s748_s10 = scalar_lea.hbm (!%p198_p10), %s1064_s4, 2 }
  0x14   : > { %s891_s29 = scalar_select %p235_p11, %s798_s18, 1  ;;  %vm294_vm0 = vcmask 523264   ;;  %v808_v8 = vmov 0   ;;  %v388_v15 = vld [vmem:[%s1063_s3] sm:$0xff]  ;;  %v390_v16 = vld [vmem:[%s1063_s3 + $0x10] sm:$0xff]  ;;  %v391_v18 = vld [vmem:[%s1063_s3 + $0x18] sm:$0xff]  ;;  %v432_v57 = vlaneseq }
  0x15   : > { %713 = vset.pattern.permute.xlu0 %v808_v8  ;;  %714 = vset.pattern.permute.xlu1 %v808_v8  ;;  %v389_v19 = vld [vmem:[%s1063_s3 + $0x8] sm:$0xff]  ;;  %v250_v25 = vld [vmem:[%s1061_s1] sm:$0xff]  ;;  %v252_v27 = vld [vmem:[%s1061_s1 + $0x10] sm:$0xff]  ;;  %vm440_vm2 = vcmask 1040384  }
  0x16   : > { %s579_s30 = sshll.u32 %s891_s29, 3  ;;  %s604_s8 = sshll.u32 %s891_s29, 5  ;;  %715 = vset.pattern.permute.xlu2 %v808_v8  ;;  %v251_v26 = vld [vmem:[%s1061_s1 + $0x8] sm:$0xff]  ;;  %v253_v28 = vld [vmem:[%s1061_s1 + $0x18] sm:$0xff]  ;;  %v433_v60 = vshrl.u32 %v432_v57, 7  ;;  %v435_v63 = vand.u32 127, %v432_v57 }
  0x17   : > { %s897_s7 = scalar_lea.vmem %s1060_s0, %s579_s30  ;;  %s249_s11 = scalar_lea.vmem %s1062_s2, %s604_s8  ;;  %394 = vperm.xlu2 %715, %v388_v15  }
  0x18   : > { %v269_v0 = vld [vmem:[%s897_s7 + $0x78] sm:$0xff]  ;;  %v268_v1 = vld [vmem:[%s897_s7 + $0x70] sm:$0xff]  ;;  %v267_v2 = vld [vmem:[%s897_s7 + $0x68] sm:$0xff]  ;;  %s493_s29 = sshll.u32 %s1014_s13, 4  ;;  %s495_s30 = sshll.u32 %s491_s26, 4  ;;  %s494_s29 = int_to_ptr.vmem [resolvable:$true] %s493_s29  ;;  %s496_s30 = int_to_ptr.hbm [resolvable:$true] %s495_s30 }
  0x19   : > { %582 = vmatpush.xpose.msk.msra.mxu0 %vm294_vm0, %v269_v0  ;;  %605 = vmatpush.xpose.msk.msra.mxu1 %vm294_vm0, %v269_v0  ;;  %v266_v3 = vld [vmem:[%s897_s7 + $0x60] sm:$0xff]  ;;  %v265_v4 = vld [vmem:[%s897_s7 + $0x58] sm:$0xff]  ;;  %v264_v5 = vld [vmem:[%s897_s7 + $0x50] sm:$0xff]  ;;  %s742_s6 = sshra.s32 %s496_s30, 4  ;;  %s743_s6 = int_to_ptr.hbm [resolvable:$true] %s742_s6 }
  0x1a   : > { %606 = vmatpush.xpose.msk.msra.mxu2 %vm294_vm0, %v269_v0  ;;  %607 = vmatpush.xpose.msk.msra.mxu3 %vm294_vm0, %v269_v0  ;;  %v263_v6 = vld [vmem:[%s897_s7 + $0x48] sm:$0xff]  ;;  %v270_v7 = vld [vmem:[%s249_s11] sm:$0xff]  ;;  %v272_v10 = vld [vmem:[%s249_s11 + $0x10] sm:$0xff]  ;;  %v436_v0 = vmul.u32 128, %v433_v60  ;;  %s744_s8 = scalar_lea.hbm %s743_s6, 1  ;;  %p749_p1 = scmp.lt.s32.totalorder %s743_s6, %s1064_s4 }
  0x1b   : > { %276 = vperm.xlu0 %713, %v270_v7   ;;  %v262_v9 = vld [vmem:[%s897_s7 + $0x40] sm:$0xff]  ;;  %286 = vperm.xlu1 %714, %v272_v10   ;;  %v261_v11 = vld [vmem:[%s897_s7 + $0x38] sm:$0xff]  ;;  %v271_v12 = vld [vmem:[%s249_s11 + $0x8] sm:$0xff]  ;;  %p745_p12 = scmp.ne.s32.totalorder %s743_s6, %s744_s8  ;;  %p750_p2 = scmp.lt.s32.totalorder %s748_s10, %s744_s8 }
  0x1c   : > { %v273_v13 = vld [vmem:[%s249_s11 + $0x18] sm:$0xff]  ;;  %v260_v14 = vld [vmem:[%s897_s7 + $0x30] sm:$0xff]  ;;  %v259_v17 = vld [vmem:[%s897_s7 + $0x28] sm:$0xff] }
  0x1d   : > { %583 = vmatpush.xpose.msk.msra.mxu0 %vm294_vm0, %v268_v1  ;;  %608 = vmatpush.xpose.msk.msra.mxu1 %vm294_vm0, %v268_v1  ;;  %v258_v20 = vld [vmem:[%s897_s7 + $0x20] sm:$0xff]  ;;  %v257_v21 = vld [vmem:[%s897_s7 + $0x18] sm:$0xff]  ;;  %v256_v22 = vld [vmem:[%s897_s7 + $0x10] sm:$0xff]  ;;  %p746_p13 = pnand %p745_p12, %p874_p4  ;;  %p751_p3 = por %p750_p2, %p749_p1 }
  0x1e   : > { %609 = vmatpush.xpose.msk.msra.mxu2 %vm294_vm0, %v268_v1  ;;  %610 = vmatpush.xpose.msk.msra.mxu3 %vm294_vm0, %v268_v1  ;;  %v255_v23 = vld [vmem:[%s897_s7 + $0x8] sm:$0xff]  ;;  %v254_v24 = vld [vmem:[%s897_s7] sm:$0xff] }
  0x1f   : > { %399 = vperm.xlu2 %715, %v389_v19   ;;  %p747_p0 = pneg %p746_p13 }
  0x21   : > { %584 = vmatpush.xpose.msk.msra.mxu0 %vm294_vm0, %v267_v2  ;;  %611 = vmatpush.xpose.msk.msra.mxu1 %vm294_vm0, %v267_v2  ;;  %p752_p5 = pnand %p751_p3, %p747_p0 }
  0x22   : > { %612 = vmatpush.xpose.msk.msra.mxu2 %vm294_vm0, %v267_v2  ;;  %613 = vmatpush.xpose.msk.msra.mxu3 %vm294_vm0, %v267_v2  ;;  %v437_v2 = vadd.s32 %v436_v0, %v435_v63 }
  0x23   : > { %281 = vperm.xlu0 %713, %v271_v12   ;;  %291 = vperm.xlu1 %714, %v273_v13  }
  0x24   : > { %vm438_vm1 = vcmp.lt.s32.totalorder %v437_v2, 8 }
  0x25   : > { %585 = vmatpush.xpose.msk.msra.mxu0 %vm294_vm0, %v266_v3  ;;  %614 = vmatpush.xpose.msk.msra.mxu1 %vm294_vm0, %v266_v3 }
  0x26   : > { %615 = vmatpush.xpose.msk.msra.mxu2 %vm294_vm0, %v266_v3  ;;  %616 = vmatpush.xpose.msk.msra.mxu3 %vm294_vm0, %v266_v3 }
  0x29   : > { %586 = vmatpush.xpose.msk.msra.mxu0 %vm294_vm0, %v265_v4  ;;  %617 = vmatpush.xpose.msk.msra.mxu1 %vm294_vm0, %v265_v4 }
  0x2a   : > { %618 = vmatpush.xpose.msk.msra.mxu2 %vm294_vm0, %v265_v4  ;;  %619 = vmatpush.xpose.msk.msra.mxu3 %vm294_vm0, %v265_v4 }
  0x2b   : > { %404 = vperm.xlu0 %713, %v390_v16   ;;  %409 = vperm.xlu1 %714, %v391_v18  }
  0x2d   : > { %587 = vmatpush.xpose.msk.msra.mxu0 %vm294_vm0, %v264_v5  ;;  %620 = vmatpush.xpose.msk.msra.mxu1 %vm294_vm0, %v264_v5 }
  0x2e   : > { %621 = vmatpush.xpose.msk.msra.mxu2 %vm294_vm0, %v264_v5  ;;  %622 = vmatpush.xpose.msk.msra.mxu3 %vm294_vm0, %v264_v5 }
  0x31   : > { %588 = vmatpush.xpose.msk.msra.mxu0 %vm294_vm0, %v263_v6  ;;  %623 = vmatpush.xpose.msk.msra.mxu1 %vm294_vm0, %v263_v6 }
  0x32   : > { %624 = vmatpush.xpose.msk.msra.mxu2 %vm294_vm0, %v263_v6  ;;  %625 = vmatpush.xpose.msk.msra.mxu3 %vm294_vm0, %v263_v6 }
  0x35   : > { %589 = vmatpush.xpose.msk.msra.mxu0 %vm294_vm0, %v262_v9  ;;  %626 = vmatpush.xpose.msk.msra.mxu1 %vm294_vm0, %v262_v9 }
  0x36   : > { %627 = vmatpush.xpose.msk.msra.mxu2 %vm294_vm0, %v262_v9  ;;  %628 = vmatpush.xpose.msk.msra.mxu3 %vm294_vm0, %v262_v9 }
  0x39   : > { %590 = vmatpush.xpose.msk.msra.mxu0 %vm294_vm0, %v261_v11  ;;  %629 = vmatpush.xpose.msk.msra.mxu1 %vm294_vm0, %v261_v11 }
  0x3a   : > { %630 = vmatpush.xpose.msk.msra.mxu2 %vm294_vm0, %v261_v11  ;;  %631 = vmatpush.xpose.msk.msra.mxu3 %vm294_vm0, %v261_v11 }
  0x3d   : > { %591 = vmatpush.xpose.msk.msra.mxu0 %vm294_vm0, %v260_v14  ;;  %632 = vmatpush.xpose.msk.msra.mxu1 %vm294_vm0, %v260_v14 }
  0x3e   : > { %633 = vmatpush.xpose.msk.msra.mxu2 %vm294_vm0, %v260_v14  ;;  %634 = vmatpush.xpose.msk.msra.mxu3 %vm294_vm0, %v260_v14 }
  0x41   : > { %592 = vmatpush.xpose.msk.msra.mxu0 %vm294_vm0, %v259_v17  ;;  %635 = vmatpush.xpose.msk.msra.mxu1 %vm294_vm0, %v259_v17 }
  0x42   : > { %636 = vmatpush.xpose.msk.msra.mxu2 %vm294_vm0, %v259_v17  ;;  %637 = vmatpush.xpose.msk.msra.mxu3 %vm294_vm0, %v259_v17 }
  0x45   : > { %593 = vmatpush.xpose.msk.msra.mxu0 %vm294_vm0, %v258_v20  ;;  %638 = vmatpush.xpose.msk.msra.mxu1 %vm294_vm0, %v258_v20 }
  0x46   : > { %639 = vmatpush.xpose.msk.msra.mxu2 %vm294_vm0, %v258_v20  ;;  %640 = vmatpush.xpose.msk.msra.mxu3 %vm294_vm0, %v258_v20 }
  0x49   : > { %594 = vmatpush.xpose.msk.msra.mxu0 %vm294_vm0, %v257_v21  ;;  %641 = vmatpush.xpose.msk.msra.mxu1 %vm294_vm0, %v257_v21 }
  0x4a   : > { %642 = vmatpush.xpose.msk.msra.mxu2 %vm294_vm0, %v257_v21  ;;  %643 = vmatpush.xpose.msk.msra.mxu3 %vm294_vm0, %v257_v21 }
  0x4d   : > { %595 = vmatpush.xpose.msk.msra.mxu0 %vm294_vm0, %v256_v22  ;;  %644 = vmatpush.xpose.msk.msra.mxu1 %vm294_vm0, %v256_v22 }
  0x4e   : > { %645 = vmatpush.xpose.msk.msra.mxu2 %vm294_vm0, %v256_v22  ;;  %646 = vmatpush.xpose.msk.msra.mxu3 %vm294_vm0, %v256_v22 }
  0x51   : > { %596 = vmatpush.xpose.msk.msra.mxu0 %vm294_vm0, %v255_v23  ;;  %647 = vmatpush.xpose.msk.msra.mxu1 %vm294_vm0, %v255_v23 }
  0x52   : > { %648 = vmatpush.xpose.msk.msra.mxu2 %vm294_vm0, %v255_v23  ;;  %649 = vmatpush.xpose.msk.msra.mxu3 %vm294_vm0, %v255_v23 }
  0x55   : > { %597 = vmatpush.xpose.msk.msra.mxu0 %vm294_vm0, %v254_v24  ;;  %650 = vmatpush.xpose.msk.msra.mxu1 %vm294_vm0, %v254_v24 }
  0x56   : > { %651 = vmatpush.xpose.msk.msra.mxu2 %vm294_vm0, %v254_v24  ;;  %652 = vmatpush.xpose.msk.msra.mxu3 %vm294_vm0, %v254_v24 }
  0x58   : > { %598 = vmatmul.msk.f32.vlgmr.msra.gmra.mxu0 %vm294_vm0, %v250_v25  ;;  %599 = vmatmul.msk.f32.vlgmr.msra.gmra.mxu1 %vm294_vm0, %v251_v26 }
  0x59   : > { %600 = vmatmul.msk.f32.vlgmr.msra.gmra.mxu2 %vm294_vm0, %v252_v27  ;;  %601 = vmatmul.msk.f32.vlgmr.msra.gmra.mxu3 %vm294_vm0, %v253_v28 }
  0x71   : > { %v395_v36 = vpop.permute.xlu2 %394 }
  0x79   : > { %v400_v44 = vpop.permute.xlu2 %399 }
  0x8d   : > { %v277_v29 = vpop.permute.xlu0 %276  ;;  %v287_v30 = vpop.permute.xlu1 %286 }
  0x95   : > { %v282_v31 = vpop.permute.xlu0 %281  ;;  %v292_v37 = vpop.permute.xlu1 %291 }
  0x9d   : > { %v405_v48 = vpop.permute.xlu0 %404  ;;  %v410_v52 = vpop.permute.xlu1 %409 }
  0xd5   : > { %v372_v32 = vpop.f32.mrf.mxu0  ;;  %v375_v33 = vpop.f32.mrf.mxu1 }
  0xd6   : > { %v373_v34 = vadd.f32 %v372_v32, %v277_v29  ;;  %v376_v35 = vadd.f32 %v375_v33, %v282_v31 }
  0xd8   : > { %716 = vtanh.f32 %v373_v34 }
  0xd9   : > { %718 = vtanh.f32 %v376_v35 }
  0xdc   : > { %v378_v38 = vpop.f32.mrf.mxu2  ;;  %v381_v39 = vpop.f32.mrf.mxu3 }
  0xdd   : > { %v379_v40 = vadd.f32 %v378_v38, %v287_v30  ;;  %v382_v41 = vadd.f32 %v381_v39, %v292_v37 }
  0xde   : > { %v717_v42 = vpop.eup %716 }
  0xdf   : > { %v719_v43 = vpop.eup %718  ;;  %720 = vtanh.f32 %v379_v40  ;;  %v412_v45 = vmul.f32 %v717_v42, %v395_v36 }
  0xe0   : > { %722 = vtanh.f32 %v382_v41  ;;  %v413_v46 = vmul.f32 %v719_v43, %v400_v44 }
  0xe2   : > { %v416_v50 = vadd.f32 %v413_v46, %v412_v45 }
  0xe5   : > { %v721_v47 = vpop.eup %720 }
  0xe6   : > { %v723_v49 = vpop.eup %722  ;;  %v414_v51 = vmul.f32 %v721_v47, %v405_v48 }
  0xe7   : > { %v415_v54 = vmul.f32 %v723_v49, %v410_v52 }
  0xe8   : > { %v417_v53 = vadd.f32 %v416_v50, %v414_v51 }
  0xea   : > { %v418_v55 = vadd.f32 %v417_v53, %v415_v54 }
  0xec   : > { %v419_v56 = vrot.slane %v418_v55, 4 }
  0xee   : > { %v420_v58 = vadd.f32 %v419_v56, %v418_v55 }
  0xf0   : > { %v421_v59 = vrot.slane %v420_v58, 2 }
  0xf2   : > { %v422_v61 = vadd.f32 %v421_v59, %v420_v58 }
  0xf4   : > { %v423_v62 = vrot.slane %v422_v61, 1 }
  0xf6   : > { %v424_v1 = vadd.f32 %v423_v62, %v422_v61 }
  0xf8   : > { %426 = vst [vmem:[%s1014_s13] sm:$0x1] %v424_v1 }
  0xff   : > { %v431_v3 = vld [vmem:[%s1014_s13] sm:$0x1] }
 0x100   : > { %v439_v4 = vsel %vm438_vm1, %v431_v3, -inf }
 0x101   : > { %v441_v5 = vsel %vm440_vm2, %v439_v4, -inf }
 0x102   : > { %442 = vmax.xlane.f32.xlu2 %v441_v5 }
 0x175   : > { %v443_v6 = vpop.xlane.xlu2 %442 }
 0x176   : > { %v444_v7 = vrot.slane %v443_v6, 4 }
 0x178   : > { %v445_v8 = vmax.f32 %v443_v6, %v444_v7 }
 0x17a   : > { %v446_v9 = vrot.slane %v445_v8, 2 }
 0x17c   : > { %v447_v10 = vmax.f32 %v445_v8, %v446_v9 }
 0x17e   : > { %v448_v11 = vrot.slane %v447_v10, 1 }
 0x180   : > { %v449_v12 = vmax.f32 %v447_v10, %v448_v11 }
 0x182   : > { %653 = vpush %v449_v12 }
 0x1b3   : > { %s654_s14 = spop %653 }
 0x1b4   : > { %v451_v13 = vstv %s654_s14 }
 0x1b5   : > { %v452_v14 = vsub.f32 %v439_v4, %v451_v13 }
 0x1b7   : > { %v453_v15 = vmul.f32 1.442695, %v452_v14 }
 0x1b9   : > { %724 = vpow2.f32 %v453_v15 }
 0x1bf   : > { %v725_v16 = vpop.eup %724 }
 0x1c0   : > { %v455_v17 = vsel %vm440_vm2, %v725_v16, 0.0 }
 0x1c1   : > { %456 = vadd.xlane.f32.xlu0 %v455_v17 }
 0x234   : > { %v457_v18 = vpop.xlane.xlu0 %456 }
 0x235   : > { %v458_v19 = vrot.slane %v457_v18, 4 }
 0x237   : > { %v459_v20 = vadd.f32 %v458_v19, %v457_v18 }
 0x239   : > { %v460_v21 = vrot.slane %v459_v20, 2 }
 0x23b   : > { %v461_v22 = vadd.f32 %v460_v21, %v459_v20 }
 0x23d   : > { %v462_v23 = vrot.slane %v461_v22, 1 }
 0x23f   : > { %v463_v24 = vadd.f32 %v462_v23, %v461_v22 }
 0x241   : > { %655 = vpush %v463_v24 }
 0x272   : > { %s656_s21 = spop %655 }
 0x273   : > { %v465_v25 = vstv %s656_s21 }
 0x274   : > { %726 = vrcp.f32 %v465_v25  ;;  %v477_v29 = vand.u32 2147483648, %v465_v25  ;;  %v475_v31 = vand.u32 2147483647, %v465_v25  ;;  %vm471_vm4 = vweird.f32 %v465_v25 }
 0x276   : > { %v478_v33 = vor.u32 1.1754944e-38, %v477_v29  ;;  %vm476_vm6 = vcmp.eq.f32.partialorder %v475_v31, 8.507059e+37 }
 0x27a   : > { %v727_v26 = vpop.eup %726 }
 0x27b   : > { %v467_v27 = vmul.f32 %v727_v26, %v465_v25  ;;  %vm472_vm3 = vweird.f32 %v727_v26 }
 0x27c   : > { %vm473_vm5 = vmor %vm471_vm4, %vm472_vm3 }
 0x27d   : > { %v468_v28 = vsub.f32 1.0, %v467_v27 }
 0x27f   : > { %v469_v30 = vmul.f32 %v727_v26, %v468_v28 }
 0x281   : > { %v470_v32 = vadd.f32 %v727_v26, %v469_v30 }
 0x283   : > { %v474_v34 = vsel %vm473_vm5, %v727_v26, %v470_v32 }
 0x284   : > { %v479_v35 = vsel %vm476_vm6, %v478_v33, %v474_v34 }
 0x285   : > { %v480_v36 = vmul.f32 %v725_v16, %v479_v35 }
 0x287   : > { %481 = vst [vmem:[%s1014_s13] sm:$0x1] %v480_v36 }
 0x288   : > { %755 = shalt.err (!%p752_p5)
}
 0x289   : > { %657 = dma.vmem_to_hbm [thread:$0]  (%p874_p4), %s494_s29, 16, %s496_s30, %s483_s5  }
 0x28a PF: > { %p663_p6 = scmp.ge.s32.totalorder %s806_s20, 2  ;;  %s507_s12 = sand.u32 1, %s786_s15  }
 0x28b   : > { %s508_s13 = scalar_lea.sflag [#allocation3], %s507_s12 }
 0x28c   : > { %p660_p7 = pnand %p663_p6, %p881_p8 }
 0x28e   : > { %p661_p9 = pneg %p660_p7 }
 0x290   : > { %781 = dma.done.wait (%p661_p9), %s508_s13, 16  }
 0x291   : > { %783 = vsyncadd (%p661_p9), %s508_s13, 4294967280  ;;  %s17_s20 = sadd.s32 1, %s806_s20   ;;  %s1067_s15 = smov %s790_s16 }
 0x292   : > { %p14_p10 = scmp.ge.s32.totalorder %s17_s20, 4   ;;  %s1068_s16 = smov %s794_s17 }
 0x293   : > { %s1069_s17 = smov %s887_s28  ;;  %s1070_s18 = smov %s802_s19 }
 0x294   : > { %s1071_s19 = smov %s1073_s23  ;;  %16 = sbr.rel (!%p14_p10) target bundleno = 4 (0x4), region = 79 }
 0x299   :  { %513 = vsyncpa [#allocation3], 1 }
 0x29a   :  { %515 = vsyncpa [#allocation3 + $0x1], 1 }

</bundles_post_ra>
